<compile_context>
chip_gen: v7x
topology: tpu7x:2x2x1
jax: 0.10.0
libtpu: 0.0.40
codegen_flags: <defaults>
</compile_context>

<pallas_src>
import functools

import jax
import jax.numpy as jnp
from jax import lax
from jax.experimental import pallas as pl
from jax.experimental.pallas import tpu as pltpu


def _depth_to_space_kernel(x_ref, o_ref, *, bs, c_out, h_t, W, precision):
    """x_ref: (C, h_t, W) block;  o_ref: (c_out, h_t, bs*W*bs) block."""
    Wo = W * bs
    f32 = jnp.float32

    # One-hot column-spread matrices, one per column phase b2 (2-D, built once;
    # never broadcast over c_out):  S_b2[w, l] = 1  iff  l == w*bs + b2.
    wi = lax.broadcasted_iota(jnp.int32, (W, Wo), 0)   # input col index w
    li = lax.broadcasted_iota(jnp.int32, (W, Wo), 1)   # output col index l
    spread = [(li == wi * bs + b2).astype(f32) for b2 in range(bs)]

    for b1 in range(bs):                               # row phase
        seg = None                                     # (c_out*h_t, Wo)
        for b2 in range(bs):                           # column phase
            g = b1 * bs + b2
            xs = x_ref[g * c_out:(g + 1) * c_out, :, :].astype(f32)
            xs2 = xs.reshape(c_out * h_t, W)
            m = jnp.dot(xs2, spread[b2], precision=precision,
                        preferred_element_type=f32)    # (c_out*h_t, Wo)
            seg = m if seg is None else seg + m        # disjoint lanes -> exact
        # Row phase b1 occupies the contiguous lane range [b1*Wo, (b1+1)*Wo)
        # of the (N, c_out, H, bs*Wo) output view: a plain static-slice store.
        o_ref[:, :, b1 * Wo:(b1 + 1) * Wo] = (
            seg.reshape(c_out, h_t, Wo).astype(o_ref.dtype))


def _pick_h_tile(H, C, W, itemsize, target_bytes=1 << 20):
    """Largest multiple-of-8 divisor of H whose input block stays <= ~1 MiB."""
    if H % 8 != 0:
        return H                      # tiny/odd H: single tile over rows
    per_row = C * W * itemsize
    best = 8
    for t in range(8, H + 1, 8):
        if H % t == 0 and t * per_row <= target_bytes:
            best = max(best, t)
    return best


def depth_to_space(x, block_size, *, h_tile=None):
    """Pallas TPU implementation of DepthToSpace.forward (NCHW)."""
    N, C, H, W = x.shape
    bs = int(block_size)
    assert C % (bs * bs) == 0, "C must be divisible by block_size**2"
    c_out = C // (bs * bs)
    Ho, Wo = H * bs, W * bs

    if h_tile is None:
        h_tile = _pick_h_tile(H, C, W, jnp.dtype(x.dtype).itemsize)
    assert H % h_tile == 0, "h_tile must divide H"

    # f32 data would be silently truncated to bf16 under DEFAULT matmul
    # precision; HIGHEST keeps the one-hot spread exact.  bf16 is exact as-is.
    precision = (lax.Precision.DEFAULT if x.dtype == jnp.bfloat16
                 else lax.Precision.HIGHEST)

    kernel = functools.partial(
        _depth_to_space_kernel, bs=bs, c_out=c_out, h_t=h_tile, W=W,
        precision=precision)

    # Kernel output layout: (N, c_out, H, bs*Wo).  Reshaping it to
    # (N, c_out, H*bs, Wo) afterwards is a free row-major reinterpretation.
    y4 = pl.pallas_call(
        kernel,
        out_shape=jax.ShapeDtypeStruct((N, c_out, H, bs * Wo), x.dtype),
        grid=(N, H // h_tile),
        in_specs=[pl.BlockSpec((None, C, h_tile, W),
                               lambda n, h: (n, 0, h, 0))],
        out_specs=pl.BlockSpec((None, c_out, h_tile, bs * Wo),
                               lambda n, h: (n, 0, h, 0)),
        compiler_params=pltpu.CompilerParams(
            dimension_semantics=("parallel", "parallel"),
            vmem_limit_bytes=32 * 1024 * 1024),
    )(x)
    return y4.reshape(N, c_out, Ho, Wo)


def _reference_depth_to_space(x, bs):
    """Pure-JAX mirror of the PyTorch forward (view / permute / view)."""
    N, C, H, W = x.shape
    c_out = C // (bs * bs)
    x = x.reshape(N, bs, bs, c_out, H, W)
    x = jnp.transpose(x, (0, 3, 4, 1, 5, 2))
    return x.reshape(N, c_out, H * bs, W * bs)


if __name__ == "__main__":
    key = jax.random.PRNGKey(0)
    # DepthToSpace(block_size=2); small NCHW input consistent with the module.
    block_size = 2
    N, C, H, W = 2, 16, 16, 16
    x = jax.random.normal(key, (N, C, H, W), dtype=jnp.float32)

    ref = _reference_depth_to_space(x, block_size)

    # Auto-tiled run.
    y = jax.block_until_ready(depth_to_space(x, block_size))
    assert y.shape == ref.shape, (y.shape, ref.shape)
    assert y.dtype == ref.dtype, (y.dtype, ref.dtype)
    assert jnp.allclose(y, ref, atol=1e-6, rtol=1e-6), "mismatch vs reference"

    # Explicit smaller row tile -> exercises the multi-step (N, H//h_tile) grid.
    y2 = jax.block_until_ready(depth_to_space(x, block_size, h_tile=8))
    assert jnp.allclose(y2, ref, atol=1e-6, rtol=1e-6), "mismatch (h_tile=8)"

    print("KERNEL_OK")
</pallas_src>

<mosaic_0001>
module attributes {stable_mosaic.version = 11 : i64} {
  func.func @_depth_to_space_kernel(%arg0: i32, %arg1: i32, %arg2: memref<1x16x16x16xf32, #tpu.memory_space<vmem>>, %arg3: memref<1x4x16x64xf32, #tpu.memory_space<vmem>>) attributes {dimension_semantics = [#tpu.dimension_semantics<parallel>, #tpu.dimension_semantics<parallel>], iteration_bounds = array<i64: 2, 1>, scalar_prefetch = 0 : i64, scratch_operands = 0 : i64, tpu.core_type = #tpu.core_type<tc>, window_params = [{transform_indices = @transform_0, window_bounds = array<i64: 1, 16, 16, 16>}, {transform_indices = @transform_1, window_bounds = array<i64: 1, 4, 16, 64>}]} {
    %0 = tpu.iota {dimensions = array<i32: 0>} : vector<16x32xi32>
    %1 = tpu.iota {dimensions = array<i32: 1>} : vector<16x32xi32>
    %c2_i32 = arith.constant 2 : i32
    %2 = vector.broadcast %c2_i32 : i32 to vector<16x32xi32>
    %3 = arith.muli %0, %2 : vector<16x32xi32>
    %c0_i32 = arith.constant 0 : i32
    %4 = vector.broadcast %c0_i32 : i32 to vector<16x32xi32>
    %5 = arith.addi %3, %4 : vector<16x32xi32>
    %6 = arith.cmpi eq, %1, %5 : vector<16x32xi32>
    %7 = arith.extui %6 : vector<16x32xi1> to vector<16x32xi32>
    %8 = arith.sitofp %7 : vector<16x32xi32> to vector<16x32xf32>
    %c2_i32_0 = arith.constant 2 : i32
    %9 = vector.broadcast %c2_i32_0 : i32 to vector<16x32xi32>
    %10 = arith.muli %0, %9 : vector<16x32xi32>
    %c1_i32 = arith.constant 1 : i32
    %11 = vector.broadcast %c1_i32 : i32 to vector<16x32xi32>
    %12 = arith.addi %10, %11 : vector<16x32xi32>
    %13 = arith.cmpi eq, %1, %12 : vector<16x32xi32>
    %14 = arith.extui %13 : vector<16x32xi1> to vector<16x32xi32>
    %15 = arith.sitofp %14 : vector<16x32xi32> to vector<16x32xf32>
    %c0 = arith.constant 0 : index
    %c0_1 = arith.constant 0 : index
    %c0_2 = arith.constant 0 : index
    %c0_3 = arith.constant 0 : index
    %16 = vector.load %arg2[%c0, %c0_1, %c0_2, %c0_3] : memref<1x16x16x16xf32, #tpu.memory_space<vmem>>, vector<1x4x16x16xf32>
    %17 = vector.shape_cast %16 : vector<1x4x16x16xf32> to vector<4x16x16xf32>
    %18 = vector.shape_cast %17 : vector<4x16x16xf32> to vector<64x16xf32>
    %cst = arith.constant dense<0.000000e+00> : vector<64x32xf32>
    %19 = tpu.matmul %18, %8, %cst {dimension_numbers = #tpu.dot_dimension_numbers<[1], [0], [0], [1], [0, 0, 1, 1], [], []>, precision = #tpu.contract_precision<fp32>} : vector<64x16xf32>, vector<16x32xf32>, vector<64x32xf32> -> vector<64x32xf32>
    %c0_4 = arith.constant 0 : index
    %c4 = arith.constant 4 : index
    %c0_5 = arith.constant 0 : index
    %c0_6 = arith.constant 0 : index
    %20 = vector.load %arg2[%c0_4, %c4, %c0_5, %c0_6] : memref<1x16x16x16xf32, #tpu.memory_space<vmem>>, vector<1x4x16x16xf32>
    %21 = vector.shape_cast %20 : vector<1x4x16x16xf32> to vector<4x16x16xf32>
    %22 = vector.shape_cast %21 : vector<4x16x16xf32> to vector<64x16xf32>
    %cst_7 = arith.constant dense<0.000000e+00> : vector<64x32xf32>
    %23 = tpu.matmul %22, %15, %cst_7 {dimension_numbers = #tpu.dot_dimension_numbers<[1], [0], [0], [1], [0, 0, 1, 1], [], []>, precision = #tpu.contract_precision<fp32>} : vector<64x16xf32>, vector<16x32xf32>, vector<64x32xf32> -> vector<64x32xf32>
    %24 = arith.addf %19, %23 : vector<64x32xf32>
    %25 = vector.shape_cast %24 : vector<64x32xf32> to vector<4x16x32xf32>
    %c0_8 = arith.constant 0 : index
    %c0_9 = arith.constant 0 : index
    %c0_10 = arith.constant 0 : index
    %c0_11 = arith.constant 0 : index
    %26 = vector.load %arg3[%c0_8, %c0_9, %c0_10, %c0_11] : memref<1x4x16x64xf32, #tpu.memory_space<vmem>>, vector<1x4x16x32xf32>
    %27 = vector.shape_cast %26 : vector<1x4x16x32xf32> to vector<4x16x32xf32>
    %28 = vector.shape_cast %25 : vector<4x16x32xf32> to vector<1x4x16x32xf32>
    tpu.vector_store %arg3[%c0_8, %c0_9, %c0_10, %c0_11], %28 {strides = array<i32>} : memref<1x4x16x64xf32, #tpu.memory_space<vmem>>, vector<1x4x16x32xf32>,
    %c0_12 = arith.constant 0 : index
    %c8 = arith.constant 8 : index
    %c0_13 = arith.constant 0 : index
    %c0_14 = arith.constant 0 : index
    %29 = vector.load %arg2[%c0_12, %c8, %c0_13, %c0_14] : memref<1x16x16x16xf32, #tpu.memory_space<vmem>>, vector<1x4x16x16xf32>
    %30 = vector.shape_cast %29 : vector<1x4x16x16xf32> to vector<4x16x16xf32>
    %31 = vector.shape_cast %30 : vector<4x16x16xf32> to vector<64x16xf32>
    %cst_15 = arith.constant dense<0.000000e+00> : vector<64x32xf32>
    %32 = tpu.matmul %31, %8, %cst_15 {dimension_numbers = #tpu.dot_dimension_numbers<[1], [0], [0], [1], [0, 0, 1, 1], [], []>, precision = #tpu.contract_precision<fp32>} : vector<64x16xf32>, vector<16x32xf32>, vector<64x32xf32> -> vector<64x32xf32>
    %c0_16 = arith.constant 0 : index
    %c12 = arith.constant 12 : index
    %c0_17 = arith.constant 0 : index
    %c0_18 = arith.constant 0 : index
    %33 = vector.load %arg2[%c0_16, %c12, %c0_17, %c0_18] : memref<1x16x16x16xf32, #tpu.memory_space<vmem>>, vector<1x4x16x16xf32>
    %34 = vector.shape_cast %33 : vector<1x4x16x16xf32> to vector<4x16x16xf32>
    %35 = vector.shape_cast %34 : vector<4x16x16xf32> to vector<64x16xf32>
    %cst_19 = arith.constant dense<0.000000e+00> : vector<64x32xf32>
    %36 = tpu.matmul %35, %15, %cst_19 {dimension_numbers = #tpu.dot_dimension_numbers<[1], [0], [0], [1], [0, 0, 1, 1], [], []>, precision = #tpu.contract_precision<fp32>} : vector<64x16xf32>, vector<16x32xf32>, vector<64x32xf32> -> vector<64x32xf32>
    %37 = arith.addf %32, %36 : vector<64x32xf32>
    %38 = vector.shape_cast %37 : vector<64x32xf32> to vector<4x16x32xf32>
    %c0_20 = arith.constant 0 : index
    %c0_21 = arith.constant 0 : index
    %c0_22 = arith.constant 0 : index
    %c32 = arith.constant 32 : index
    %39 = vector.load %arg3[%c0_20, %c0_21, %c0_22, %c32] : memref<1x4x16x64xf32, #tpu.memory_space<vmem>>, vector<1x4x16x32xf32>
    %40 = vector.shape_cast %39 : vector<1x4x16x32xf32> to vector<4x16x32xf32>
    %41 = vector.shape_cast %38 : vector<4x16x32xf32> to vector<1x4x16x32xf32>
    tpu.vector_store %arg3[%c0_20, %c0_21, %c0_22, %c32], %41 {strides = array<i32>} : memref<1x4x16x64xf32, #tpu.memory_space<vmem>>, vector<1x4x16x32xf32>,
    return
  }
  func.func @transform_0(%arg0: i32, %arg1: i32) -> (i32, i32, i32, i32) {
    %c0_i32 = arith.constant 0 : i32
    %c0_i32_0 = arith.constant 0 : i32
    %c0_i32_1 = arith.constant 0 : i32
    return %arg0, %c0_i32, %arg1, %c0_i32_0 : i32, i32, i32, i32
  }
  func.func @transform_1(%arg0: i32, %arg1: i32) -> (i32, i32, i32, i32) {
    %c0_i32 = arith.constant 0 : i32
    %c0_i32_0 = arith.constant 0 : i32
    %c0_i32_1 = arith.constant 0 : i32
    return %arg0, %c0_i32, %arg1, %c0_i32_0 : i32, i32, i32, i32
  }
}

</mosaic_0001>

<bundles_post_ra>
// kernel: tpu_custom_call.1
= control target key start
LH: loop header
LB: loop body
LE: loop exit
PB: predicated region body
PF: predicated region fallthrough
CT: control target
= control target key end

     0   :  { %6 = vsyncpa [#allocation3], 0  ;;  %s5570_s0 = inlined_call_operand.hbm [shape: f32[2,16,16,16], index: 0, kind: input, shape index: {}]   ;;  %s5571_s1 = inlined_call_operand.hbm [shape: f32[2,4,16,64], index: 1, kind: output, shape index: {}]  }
   0x1   :  { %8 = vsyncpa [#allocation3 + $0x1], 0 }
   0x2   :  { %9 = vsyncpa [#allocation4], 0 }
   0x3   :  { %11 = vsyncpa [#allocation4 + $0x1], 0  ;;  %s4668_s6 = smov 0   ;;  %s4670_s7 = smov 0  }
   0x4   :  { %s4672_s8 = smov 0   ;;  %s4674_s9 = smov 0  }
   0x5   :  { %s4676_s10 = smov 0   ;;  %s4678_s11 = smov 0  }
   0x6 LB: > { %s3501_s12 = sadd.s32 4294967295, %s4647_s11   ;;  %s3502_s13 = sadd.s32 4294967294, %s4647_s11   ;;  %s4647_s11 = sphi %s4678_s11, %s17_s11   ;;  %s4643_s10 = sphi %s4676_s10, %s5610_s10   ;;  %s4639_s9 = sphi %s4674_s9, %s5609_s9   ;;  %s4635_s8 = sphi %s4672_s8, %s5608_s8   ;;  %s4631_s7 = sphi %s4670_s7, %s5607_s7   ;;  %s4627_s6 = sphi %s4668_s6, %s5606_s6  }
   0x7   : > { %s29_s14 = sadd.s32 1, %s4643_s10  ;;  %s38_s15 = sadd.s32 1, %s4635_s8 }
   0x8   : > { %p31_p0 = scmp.ge.s32.totalorder %s29_s14, 2  ;;  %p45_p1 = scmp.ne.s32.totalorder %s4635_s8, %s4631_s7 }
   0x9   : > { %p46_p2 = scmp.eq.s32.totalorder %s4647_s11, 0  ;;  %p51_p3 = scmp.ne.s32.totalorder %s4631_s7, %s4627_s6 }
   0xa   : > { %s5612_s14 = smov (%p31_p0, %s29_s14), 0  ;;  %p52_p5 = scmp.eq.s32.totalorder %s3501_s12, 0 }
   0xb   : > { %p4709_p4 = por %p46_p2, %p45_p1  ;;  %s33_s17 = ssub.s32 %s4643_s10, %s5612_s14 }
   0xc   : > { %p77_p6 = scmp.eq.s32.totalorder %s3501_s12, 1  ;;  %p36_p7 = scmp.eq.s32.totalorder %s33_s17, 0 }
   0xd   : > { %p4715_p8 = por %p52_p5, %p51_p3  ;;  %p83_p10 = scmp.eq.s32.totalorder %s3502_s13, 1 }
   0xe   : > { %p4719_p9 = por %p77_p6, %p45_p1  ;;  %p4478_p13 = scmp.lt.s32.totalorder %s4647_s11, 2 }
   0xf   : > { %s4724_s20 = scalar_select %p36_p7, %s4635_s8, %s38_s15  }
  0x10   : > { %s5584_s19 = scalar_select %p4719_p9, 1, 0 }
  0x11   : > { %p4726_p11 = por %p83_p10, %p51_p3  ;;  %s103_s22 = sand.u32 1, %s4635_s8  }
  0x12   : > { %s3505_s23 = sshll.u32 %s103_s22, 8  ;;  %s3568_s24 = sshll.u32 %s4643_s10, 12 }
  0x13   : > { %s5585_s21 = scalar_select %p4726_p11, 1, 0 }
  0x14   : > { %s4737_s27 = scalar_lea.hbm %s5570_s0, %s3568_s24  ;;  %s107_s28 = scalar_lea.vmem [#allocation2], %s3505_s23 }
  0x15   : > { %s116_s29 = sshll.u32 %s107_s28, 4  ;;  %p4743_p0 = pnand %p4478_p13, %p4709_p4  ;;  %s4739_s29 = int_to_ptr.vmem [resolvable:$true] %s116_s29 }
  0x16   : > { %s4748_s2 = scalar_lea.sflag [#allocation3], %s103_s22  ;;  %s4535_s3 = scalar_lea.hbm %s4737_s27, 4096 }
  0x17   : > { %p4536_p2 = scmp.ne.s32.totalorder %s4737_s27, %s4535_s3  ;;  %p4537_p3 = pneg %p4743_p0 }
  0x18   : > { %s4540_s12 = scalar_lea.hbm %s5570_s0, 8192  ;;  %p4541_p4 = scmp.lt.u32.totalorder %s4737_s27, %s5570_s0 }
  0x19   : > { %p4538_p5 = pnand %p4537_p3, %p4536_p2  ;;  %p4542_p7 = scmp.lt.u32.totalorder %s4540_s12, %s4535_s3 }
  0x1a   : > { %p4544_p13 = scmp.lt.u32.totalorder %s4535_s3, %s4737_s27 }
  0x1b   : > { %p4539_p6 = pneg %p4538_p5  ;;  %p4543_p10 = por %p4542_p7, %p4541_p4 }
  0x1d   : > { %p4545_p12 = por %p4544_p13, %p4543_p10 }
  0x1f   : > { %p4546_p1 = pnand %p4545_p12, %p4539_p6 }
  0x21   : > { %4549 = shalt.err (!%p4546_p1)
}
  0x22   : > { %s4550_s16 = scalar_lea.vmem %s4739_s29, 4096  ;;  %s4649_s17 = smov [#allocation2]  }
  0x23   : > { %p4551_p2 = scmp.ne.s32.totalorder %s4739_s29, %s4550_s16  ;;  %s4555_s22 = sshll.u32 %s4649_s17, 4  ;;  %s4556_s22 = int_to_ptr.vmem [resolvable:$false] %s4555_s22 }
  0x24   : > { %s4557_s23 = scalar_lea.vmem %s4556_s22, 8192  ;;  %p4558_p9 = scmp.lt.s32.totalorder %s4739_s29, %s4556_s22 }
  0x25   : > { %p4553_p5 = pnand %p4551_p2, %p4537_p3  ;;  %p4559_p4 = scmp.lt.s32.totalorder %s4557_s23, %s4550_s16 }
  0x27   : > { %p4554_p11 = pneg %p4553_p5  ;;  %p4560_p7 = por %p4559_p4, %p4558_p9 }
  0x29   : > { %p4561_p10 = pnand %p4560_p7, %p4554_p11 }
  0x2b   : > { %4564 = shalt.err (!%p4561_p10)
}
  0x2c   : > { %s4650_s24 = smov 128   ;;  %s4651_s25 = smov 8  }
  0x2d   : > { %4473 = dma.hbm_to_vmem [thread:$0]  (!%p4743_p0), %s4737_s27, 4096, %s4739_s29, %s4748_s2, %s4650_s24, %s4650_s24, %s4651_s25  }
  0x2e   : > { %p124_p12 = scmp.lt.s32.totalorder %s4647_s11, 3  ;;  %p5587_p1 = scmp.ge.s32.totalorder %s4647_s11, 1 }
  0x30   : > { %p125_p3 = pnand %p5587_p1, %p124_p12 }
  0x31   : > { %s4780_s26 = sand.u32 (!%p125_p3), 1, %s4631_s7  }
  0x32   : > { %128 = sbr.rel (%p125_p3) target bundleno = 617 (0x269), region = 24  ;;  %s3509_s28 = sshll.u32 (!%p125_p3), %s4780_s26, 8 }
  0x33   : > { %s131_s3 = scalar_lea.sflag (!%p125_p3), [#allocation3], %s4780_s26  ;;  %s4784_s4 = scalar_lea.vmem (!%p125_p3), [#allocation2], %s3509_s28 }
  0x39   : > { %4618 = dma.done.wait (%p4715_p8), %s131_s3, 4096  }
  0x3a   : > { %4620 = vsyncadd (%p4715_p8), %s131_s3, 4294963200  ;;  %v155_v0 = vlaneseq  ;;  %vm193_vm0 = vcmask 130048   ;;  %v3515_v8 = vld [vmem:[%s4784_s4 + $0x40] sm:$0xff]  ;;  %v3516_v10 = vld [vmem:[%s4784_s4 + $0x48] sm:$0xff]  ;;  %v4652_v11 = vmov 0.0   ;;  %s3510_s18 = sshll.u32 %s4780_s26, 6 }
  0x3b   : > { %v3543_v9 = vld [vmem:[%s4784_s4 + $0xc0] sm:$0xff]  ;;  %v195_v14 = vsel %vm193_vm0, %v3515_v8, 0  ;;  %v3544_v16 = vld [vmem:[%s4784_s4 + $0xc8] sm:$0xff]  ;;  %v198_v19 = vsel %vm193_vm0, %v3516_v10, 0  ;;  %v3517_v21 = vld [vmem:[%s4784_s4 + $0x50] sm:$0xff]  ;;  %vm1762_vm7 = vcmask 261120  }
  0x3c   : > { %v156_v1 = vshrl.u32 %v155_v0, 7  ;;  %v4792_v3 = vand.u32 127, %v155_v0  ;;  %v1790_v15 = vsel %vm193_vm0, %v3543_v9, 0  ;;  %v4814_v17 = vand.u32 4294901760, %v195_v14  ;;  %v3545_v30 = vld [vmem:[%s4784_s4 + $0xd0] sm:$0xff]  ;;  %v3518_v52 = vld [vmem:[%s4784_s4 + $0x58] sm:$0xff] }
  0x3d   : > { %v4816_v18 = vand.u32 4294901760, %v1790_v15  ;;  %v1793_v20 = vsel %vm193_vm0, %v3544_v16, 0  ;;  %v4822_v22 = vand.u32 4294901760, %v198_v19  ;;  %v4653_v31 = vmov 1.0|1.0   ;;  %v3546_v53 = vld [vmem:[%s4784_s4 + $0xd8] sm:$0xff] }
  0x3e   : > { %v4790_v2 = vadd.s32 8, %v156_v1  ;;  %v160_v4 = vmul.u32 2, %v156_v1  ;;  %v4824_v23 = vand.u32 4294901760, %v1793_v20  ;;  %v4832_v26 = vsub.f32 %v195_v14, %v4814_v17  ;;  %v3519_v54 = vld [vmem:[%s4784_s4 + $0x60] sm:$0xff]  ;;  %v3520_v0 = vld [vmem:[%s4784_s4 + $0x68] sm:$0xff]  ;;  %v3521_v16 = vld [vmem:[%s4784_s4 + $0x70] sm:$0xff] }
  0x3f   : > { %v4835_v27 = vsub.f32 %v1790_v15, %v4816_v18  ;;  %v4848_v32 = vsub.f32 %v198_v19, %v4822_v22  ;;  %v201_v35 = vsel %vm193_vm0, %v3517_v21, 0  ;;  %v1796_v43 = vsel %vm193_vm0, %v3545_v30, 0  ;;  %v3547_v63 = vld [vmem:[%s4784_s4 + $0xe0] sm:$0xff]  ;;  %v3548_v15 = vld [vmem:[%s4784_s4 + $0xe8] sm:$0xff]  ;;  %s5480_s27 = scalar_lea.vmem [#allocation5], %s3510_s18  ;;  %s4654_s29 = smov 32  }
  0x40   : > { %v161_v5 = vmul.u32 2, %v4790_v2  ;;  %v168_v6 = vadd.s32 1, %v160_v4  ;;  %vm4796_vm1 = vcmp.eq.s32.totalorder %v4792_v3, %v160_v4  ;;  %v4851_v33 = vsub.f32 %v1793_v20, %v4824_v23  ;;  %s3569_s30 = sshll.u32 %s4639_s9, 10  ;;  %s3414_s2 = sshll.u32 %s5480_s27, 4  ;;  %s5519_s2 = int_to_ptr.vmem [resolvable:$true] %s3414_s2 }
  0x41   : > { %v4806_v12 = vsel %vm4796_vm1, 1.0, %v4652_v11  ;;  %v287_v36 = vand.u32 4294901760, %v4832_v26  ;;  %v1882_v37 = vand.u32 4294901760, %v4835_v27  ;;  %v4865_v39 = vand.u32 4294901760, %v201_v35  ;;  %s5517_s13 = scalar_lea.hbm %s5571_s1, %s3569_s30  ;;  %s3399_s9 = scalar_lea.sflag [#allocation4], %s4780_s26 }
  0x42   : > { %v169_v13 = vadd.s32 1, %v161_v5  ;;  %vm170_vm2 = vcmp.eq.s32.totalorder %v4792_v3, %v168_v6  ;;  %v297_v40 = vand.u32 4294901760, %v4848_v32  ;;  %v1892_v41 = vand.u32 4294901760, %v4851_v33  ;;  %s4565_s15 = scalar_lea.vmem %s5519_s2, 1024  ;;  %p5603_p9 = scmp.ne.s32.totalorder %s5584_s19, 0 }
  0x43   : > { %v3513_v24 = vsel %vm170_vm2, 1.0, %v4652_v11  ;;  %v288_v44 = vsub.f32 %v4832_v26, %v287_v36  ;;  %v1883_v45 = vsub.f32 %v4835_v27, %v1882_v37  ;;  %v4881_v47 = vsub.f32 %v201_v35, %v4865_v39  ;;  %p4566_p8 = scmp.ne.s32.totalorder %s5519_s2, %s4565_s15  ;;  %s4655_s16 = smov [#allocation5]  }
  0x44   : > { %vm171_vm3 = vcmp.eq.s32.totalorder %v4792_v3, %v169_v13  ;;  %v4838_v29 = vsub.f32 %v3513_v24, %v3513_v24  ;;  %v298_v48 = vsub.f32 %v4848_v32, %v297_v40  ;;  %v1893_v49 = vsub.f32 %v4851_v33, %v1892_v41  ;;  %s4569_s17 = sshll.u32 %s4655_s16, 4  ;;  %s4570_s17 = int_to_ptr.vmem [resolvable:$false] %s4569_s17 }
  0x45   : > { %vm4827_vm4 = vmpackc.low %vm171_vm3, %vm170_vm2  ;;  %v3514_v28 = vsel %vm171_vm3, 1.0, %v4652_v11  ;;  %v4892_v51 = vand.u32 4294901760, %v1796_v43  ;;  %v289_v55 = vand.u32 4294901760, %v288_v44  ;;  %v1884_v56 = vand.u32 4294901760, %v1883_v45  ;;  %p4567_p11 = pnand %p4566_p8, %p5603_p9  ;;  %s4571_s22 = scalar_lea.vmem %s4570_s17, 2048 }
  0x46   : > { %4195 = vmatprep.subr.msk.bf16.mxu0 %vm4827_vm4, %v4653_v31  ;;  %4243 = vmatprep.subr.msk.bf16.mxu1 %vm4827_vm4, %v4653_v31  ;;  %v4853_v34 = vsub.f32 %v3514_v28, %v3514_v28  ;;  %v368_v38 = vand.u32 4294901760, %v4838_v29  ;;  %v307_v58 = vand.u32 4294901760, %v4881_v47  ;;  %v299_v59 = vand.u32 4294901760, %v298_v48  ;;  %p4572_p6 = scmp.lt.s32.totalorder %s5519_s2, %s4570_s17  ;;  %p4573_p13 = scmp.lt.s32.totalorder %s4571_s22, %s4565_s15 }
  0x47   : > { %4197 = vmatpush3.bf16.msk.msra.mxu0 %vm4827_vm4, %v4653_v31  ;;  %4245 = vmatpush3.bf16.msk.msra.mxu1 %vm4827_vm4, %v4653_v31  ;;  %v1894_v60 = vand.u32 4294901760, %v1893_v49  ;;  %v4899_v62 = vsub.f32 %v1796_v43, %v4892_v51  ;;  %v204_v4 = vsel %vm193_vm0, %v3518_v52, 0  ;;  %v1799_v6 = vsel %vm193_vm0, %v3546_v53, 0  ;;  %v3549_v49 = vld [vmem:[%s4784_s4 + $0xf0] sm:$0xff]  ;;  %p4568_p0 = pneg %p4567_p11 }
  0x48   : > { %v375_v42 = vand.u32 4294901760, %v4853_v34  ;;  %v369_v46 = vsub.f32 %v4838_v29, %v368_v38  ;;  %3814 = vmatprep.mubr.f32.mxu0 %v289_v55  ;;  %4006 = vmatprep.mubr.f32.mxu1 %v1884_v56  ;;  %v308_v1 = vsub.f32 %v4881_v47, %v307_v58  ;;  %v207_v8 = vsel %vm193_vm0, %v3519_v54, 0  ;;  %p4574_p2 = por %p4573_p13, %p4572_p6 }
  0x49   : > { %v1902_v10 = vand.u32 4294901760, %v4899_v62  ;;  %v4910_v13 = vand.u32 4294901760, %v204_v4  ;;  %v4912_v14 = vand.u32 4294901760, %v1799_v6  ;;  %v4916_v20 = vand.u32 4294901760, %v207_v8 }
  0x4a   : > { %v376_v50 = vsub.f32 %v4853_v34, %v375_v42  ;;  %v370_v57 = vand.u32 4294901760, %v369_v46  ;;  %3815 = vmatmul.mubr.f32.vlgmr.msra.gmra.mrb[0].mxu0 %v299_v59  ;;  %4007 = vmatmul.mubr.f32.vlgmr.msra.gmra.mrb[0].mxu1 %v1894_v60  ;;  %v309_v19 = vand.u32 4294901760, %v308_v1  ;;  %v1802_v21 = vsel %vm193_vm0, %v3547_v63, 0  ;;  %p4575_p5 = pnand %p4574_p2, %p4568_p0 }
  0x4b   : > { %v210_v24 = vsel %vm193_vm0, %v3520_v0, 0  ;;  %v1903_v28 = vsub.f32 %v4899_v62, %v1902_v10  ;;  %v4924_v30 = vsub.f32 %v204_v4, %v4910_v13  ;;  %v4927_v35 = vsub.f32 %v1799_v6, %v4912_v14 }
  0x4c   : > { %v377_v61 = vand.u32 4294901760, %v376_v50  ;;  %v4929_v43 = vand.u32 4294901760, %v1802_v21  ;;  %3817 = vmatprep.mubr.f32.mxu0 %v309_v19  ;;  %v4932_v44 = vsub.f32 %v207_v8, %v4916_v20  ;;  %v4934_v45 = vand.u32 4294901760, %v210_v24 }
  0x4d   : > { %v1805_v46 = vsel %vm193_vm0, %v3548_v15, 0  ;;  %v213_v48 = vsel %vm193_vm0, %v3521_v16, 0  ;;  %v1904_v50 = vand.u32 4294901760, %v1903_v28  ;;  %v317_v52 = vand.u32 4294901760, %v4924_v30  ;;  %v3550_v15 = vld [vmem:[%s4784_s4 + $0xf8] sm:$0xff] }
  0x4e   : > { %v4198_v9 = vpack.c.bf16 %v377_v61, %v370_v57  ;;  %v1912_v53 = vand.u32 4294901760, %v4927_v35  ;;  %v4942_v54 = vsub.f32 %v1802_v21, %v4929_v43  ;;  %v5575_v55 = vand.u32 4294901760, %v4932_v44 }
  0x4f   : > { %v4946_v56 = vsub.f32 %v210_v24, %v4934_v45  ;;  %v4948_v57 = vand.u32 4294901760, %v1805_v46  ;;  %v4950_v59 = vand.u32 4294901760, %v213_v48  ;;  %4009 = vmatprep.mubr.f32.mxu1 %v1904_v50  ;;  %v318_v60 = vsub.f32 %v4924_v30, %v317_v52 }
  0x50   : > { %4247 = vmatprep.subr.bf16.mxu1 %v4198_v9  ;;  %4199 = vmatprep.subr.bf16.mxu0 %v4198_v9  ;;  %v1913_v61 = vsub.f32 %v4927_v35, %v1912_v53  ;;  %v5573_v63 = vand.u32 4294901760, %v4942_v54  ;;  %v1808_v0 = vsel %vm193_vm0, %v3549_v49, 0  ;;  %v328_v1 = vsub.f32 %v4932_v44, %v5575_v55 }
  0x51   : > { %4249 = vmatpush3.bf16.msra.mxu1 %v4198_v9  ;;  %4201 = vmatpush3.bf16.msra.mxu0 %v4198_v9  ;;  %v5574_v4 = vand.u32 4294901760, %v4946_v56  ;;  %v4965_v6 = vsub.f32 %v1805_v46, %v4948_v57  ;;  %v4968_v8 = vsub.f32 %v213_v48, %v4950_v59  ;;  %v3522_v9 = vld [vmem:[%s4784_s4 + $0x78] sm:$0xff]  ;;  %v319_v16 = vand.u32 4294901760, %v318_v60 }
  0x52   : > { %v1914_v19 = vand.u32 4294901760, %v1913_v61  ;;  %v1923_v21 = vsub.f32 %v4942_v54, %v5573_v63  ;;  %v4975_v24 = vand.u32 4294901760, %v1808_v0  ;;  %v329_v28 = vand.u32 4294901760, %v328_v1 }
  0x53   : > { %v338_v49 = vsub.f32 %v4946_v56, %v5574_v4  ;;  %v1932_v46 = vand.u32 4294901760, %v4965_v6  ;;  %v5578_v48 = vand.u32 4294901760, %v4968_v8  ;;  %3818 = vmatmul.mubr.f32.gmra.mrb[2].mxu0 %v319_v16  ;;  %v216_v61 = vsel %vm193_vm0, %v3522_v9, 0 }
  0x54   : > { %4010 = vmatmul.mubr.f32.gmra.mrb[2].mxu1 %v1914_v19  ;;  %v1924_v50 = vand.u32 4294901760, %v1923_v21  ;;  %v4983_v60 = vsub.f32 %v1808_v0, %v4975_v24  ;;  %v1811_v63 = vsel %vm193_vm0, %v3550_v15, 0  ;;  %3820 = vmatprep.mubr.f32.mxu0 %v329_v28  ;;  %v4993_v16 = vand.u32 4294901760, %v216_v61 }
  0x55   : > { %v339_v1 = vand.u32 4294901760, %v338_v49  ;;  %v1933_v4 = vsub.f32 %v4965_v6, %v1932_v46  ;;  %v348_v55 = vsub.f32 %v4968_v8, %v5578_v48  ;;  %v4996_v19 = vand.u32 4294901760, %v1811_v63 }
  0x56   : > { %4012 = vmatprep.mubr.f32.mxu1 %v1924_v50  ;;  %v5576_v0 = vand.u32 4294901760, %v4983_v60  ;;  %v4202_v9 = vpack.c.bf16 %v4853_v34, %v4838_v29  ;;  %v5001_v28 = vsub.f32 %v216_v61, %v4993_v16  ;;  %vm163_vm5 = vcmp.eq.s32.totalorder %v4792_v3, %v161_v5 }
  0x57   : > { %v1934_v15 = vand.u32 4294901760, %v1933_v4  ;;  %v349_v21 = vand.u32 4294901760, %v348_v55  ;;  %3821 = vmatmul.mubr.f32.gmra.mrb[4].mxu0 %v339_v1  ;;  %v5010_v50 = vsub.f32 %v1811_v63, %v4996_v19  ;;  %vm5014_vm6 = vmpackc.low %vm163_vm5, %vm4796_vm1  ;;  %v3512_v4 = vsel %vm163_vm5, 1.0, %v4652_v11 }
  0x58   : > { %v1943_v49 = vsub.f32 %v4983_v60, %v5576_v0  ;;  %4251 = vmatprep.subr.bf16.mxu1 %v4202_v9  ;;  %v5577_v2 = vand.u32 4294901760, %v5001_v28  ;;  %4203 = vmatprep.subr.bf16.mxu0 %v4202_v9  ;;  %v1151_v61 = vsub.f32 %v4806_v12, %v4806_v12  ;;  %v5596_v29 = vand.u32 4294901760, %v4946_v56 }
  0x59   : > { %4013 = vmatmul.mubr.f32.gmra.mrb[4].mxu1 %v1934_v15  ;;  %3823 = vmatprep.mubr.f32.mxu0 %v349_v21  ;;  %v1952_v5 = vand.u32 4294901760, %v5010_v50  ;;  %v5599_v34 = vand.u32 4294901760, %v5001_v28  ;;  %vm3389_vm8 = vcmask 523520  }
  0x5a   : > { %v1944_v3 = vand.u32 4294901760, %v1943_v49  ;;  %v358_v63 = vsub.f32 %v5001_v28, %v5577_v2  ;;  %v1152_v21 = vand.u32 4294901760, %v1151_v61  ;;  %v1158_v49 = vsub.f32 %v3512_v4, %v3512_v4  ;;  %v181_v4 = vld [vmem:[%s4784_s4 + $0x28] sm:$0xff] }
  0x5b   : > { %v1953_v7 = vsub.f32 %v5010_v50, %v1952_v5 }
  0x5c   : > { %4015 = vmatprep.mubr.f32.mxu1 %v1944_v3  ;;  %v359_v1 = vand.u32 4294901760, %v358_v63  ;;  %v1153_v0 = vsub.f32 %v1151_v61, %v1152_v21  ;;  %v1159_v2 = vand.u32 4294901760, %v1158_v49 }
  0x5d   : > { %v1954_v15 = vand.u32 4294901760, %v1953_v7 }
  0x5e   : > { %3824 = vmatmul.mubr.f32.gmra.mrb[6].mxu0 %v359_v1  ;;  %v1154_v3 = vand.u32 4294901760, %v1153_v0  ;;  %v1160_v48 = vsub.f32 %v1158_v49, %v1159_v2  ;;  %v5057_v0 = vpack.c.bf16 %v1159_v2, %v1152_v21  ;;  %v3540_v21 = vld [vmem:[%s4784_s4 + $0xa8] sm:$0xff] }
  0x5f   : > { %4016 = vmatmul.mubr.f32.gmra.mrb[6].mxu1 %v1954_v15  ;;  %3830 = vmatprep.mubr.f32.mxu0 %v4814_v17 }
  0x60   : > { %4022 = vmatprep.mubr.f32.mxu1 %v4816_v18  ;;  %v1161_v11 = vand.u32 4294901760, %v1160_v48  ;;  %v5055_v48 = vpack.c.bf16 %v1158_v49, %v1151_v61  ;;  %v182_v49 = vld [vmem:[%s4784_s4 + $0x30] sm:$0xff] }
  0x62   : > { %3831 = vmatmul.mubr.f32.vlgmr.msra.gmra.mrb[0].mxu0 %v4822_v22  ;;  %v5038_v12 = vpack.c.bf16 %v1161_v11, %v1154_v3 }
  0x63   : > { %4023 = vmatmul.mubr.f32.vlgmr.msra.gmra.mrb[0].mxu1 %v4824_v23  ;;  %3833 = vmatprep.mubr.f32.mxu0 %v4865_v39 }
  0x64   : > { %4025 = vmatprep.mubr.f32.mxu1 %v4892_v51  ;;  %4253 = vmatpush3.bf16.msra.mxu1 %v4202_v9 }
  0x65   : > { %4205 = vmatpush3.bf16.msra.mxu0 %v4202_v9  ;;  %4255 = vmatprep.subr.msk.bf16.mxu1 %vm4827_vm4, %v4653_v31  ;;  %v4210_v9 = vpack.c.bf16 %v375_v42, %v368_v38  ;;  %v177_v38 = vld [vmem:[%s4784_s4 + $0x8] sm:$0xff]  ;;  %v178_v42 = vld [vmem:[%s4784_s4 + $0x10] sm:$0xff] }
  0x66   : > { %3834 = vmatmul.mubr.f32.gmra.mrb[2].mxu0 %v4910_v13  ;;  %4207 = vmatprep.subr.msk.bf16.mxu0 %vm4827_vm4, %v4653_v31 }
  0x67   : > { %4026 = vmatmul.mubr.f32.gmra.mrb[2].mxu1 %v4912_v14  ;;  %3836 = vmatprep.mubr.f32.mxu0 %v4916_v20 }
  0x68   : > { %4028 = vmatprep.mubr.f32.mxu1 %v4929_v43 }
  0x6a   : > { %3837 = vmatmul.mubr.f32.gmra.mrb[4].mxu0 %v4934_v45 }
  0x6b   : > { %4029 = vmatmul.mubr.f32.gmra.mrb[4].mxu1 %v4948_v57  ;;  %3839 = vmatprep.mubr.f32.mxu0 %v4950_v59 }
  0x6c   : > { %4031 = vmatprep.mubr.f32.mxu1 %v4975_v24 }
  0x6e   : > { %3840 = vmatmul.mubr.f32.gmra.mrb[6].mxu0 %v4993_v16 }
  0x6f   : > { %4032 = vmatmul.mubr.f32.gmra.mrb[6].mxu1 %v4996_v19  ;;  %3846 = vmatprep.mubr.f32.mxu0 %v4832_v26  ;;  %v5594_v26 = vand.u32 4294901760, %v4932_v44 }
  0x70   : > { %4038 = vmatprep.mubr.f32.mxu1 %v4835_v27  ;;  %v5595_v27 = vand.u32 4294901760, %v4942_v54 }
  0x72   : > { %3847 = vmatmul.mubr.f32.vlgmr.msra.gmra.mrb[0].mxu0 %v4848_v32  ;;  %v5597_v32 = vand.u32 4294901760, %v4968_v8 }
  0x73   : > { %4039 = vmatmul.mubr.f32.vlgmr.msra.gmra.mrb[0].mxu1 %v4851_v33  ;;  %3849 = vmatprep.mubr.f32.mxu0 %v4881_v47  ;;  %v5598_v33 = vand.u32 4294901760, %v4983_v60  ;;  %v982_v47 = vsel %vm193_vm0, %v177_v38, 0  ;;  %v3542_v38 = vld [vmem:[%s4784_s4 + $0xb8] sm:$0xff] }
  0x74   : > { %4041 = vmatprep.mubr.f32.mxu1 %v4899_v62  ;;  %4257 = vmatpush3.bf16.msk.msra.mxu1 %vm4827_vm4, %v4653_v31 }
  0x75   : > { %4209 = vmatpush3.bf16.msk.msra.mxu0 %vm4827_vm4, %v4653_v31  ;;  %4259 = vmatprep.subr.bf16.mxu1 %v4210_v9 }
  0x76   : > { %3850 = vmatmul.mubr.f32.gmra.mrb[2].mxu0 %v4924_v30  ;;  %4211 = vmatprep.subr.bf16.mxu0 %v4210_v9  ;;  %v985_v30 = vsel %vm193_vm0, %v178_v42, 0 }
  0x77   : > { %4042 = vmatmul.mubr.f32.gmra.mrb[2].mxu1 %v4927_v35  ;;  %3852 = vmatprep.mubr.f32.mxu0 %v4932_v44  ;;  %v3537_v35 = vld [vmem:[%s4784_s4 + $0x90] sm:$0xff]  ;;  %v5161_v44 = vand.u32 4294901760, %v982_v47 }
  0x78   : > { %4044 = vmatprep.mubr.f32.mxu1 %v4942_v54 }
  0x7a   : > { %3853 = vmatmul.mubr.f32.gmra.mrb[4].mxu0 %v4946_v56 }
  0x7b   : > { %4045 = vmatmul.mubr.f32.gmra.mrb[4].mxu1 %v4965_v6  ;;  %3855 = vmatprep.mubr.f32.mxu0 %v4968_v8  ;;  %v5171_v6 = vand.u32 4294901760, %v985_v30  ;;  %v2580_v8 = vsel %vm193_vm0, %v3537_v35, 0 }
  0x7c   : > { %4047 = vmatprep.mubr.f32.mxu1 %v4983_v60  ;;  %v5188_v63 = vand.u32 4294901760, %v2580_v8 }
  0x7e   : > { %3856 = vmatmul.mubr.f32.gmra.mrb[6].mxu0 %v5001_v28  ;;  %v3539_v28 = vld [vmem:[%s4784_s4 + $0xa0] sm:$0xff] }
  0x7f   : > { %4048 = vmatmul.mubr.f32.gmra.mrb[6].mxu1 %v5010_v50  ;;  %3862 = vmatprep.mubr.f32.mxu0 %v287_v36  ;;  %v176_v36 = vld [vmem:[%s4784_s4] sm:$0xff]  ;;  %v5183_v50 = vsub.f32 %v982_v47, %v5161_v44  ;;  %v2586_v15 = vsel %vm193_vm0, %v3539_v28, 0 }
  0x80   : > { %4054 = vmatprep.mubr.f32.mxu1 %v1882_v37  ;;  %v3535_v37 = vld [vmem:[%s4784_s4 + $0x80] sm:$0xff] }
  0x81   : > { %v2574_v25 = vsel %vm193_vm0, %v3535_v37, 0 }
  0x82   : > { %3863 = vmatmul.mubr.f32.vlgmr.msra.gmra.mrb[0].mxu0 %v297_v40  ;;  %v979_v40 = vsel %vm193_vm0, %v176_v36, 0  ;;  %v5154_v62 = vand.u32 4294901760, %v2574_v25 }
  0x83   : > { %4055 = vmatmul.mubr.f32.vlgmr.msra.gmra.mrb[0].mxu1 %v1892_v41  ;;  %3865 = vmatprep.mubr.f32.mxu0 %v307_v58  ;;  %v3536_v41 = vld [vmem:[%s4784_s4 + $0x88] sm:$0xff]  ;;  %v5151_v58 = vand.u32 4294901760, %v979_v40 }
  0x84   : > { %4057 = vmatprep.mubr.f32.mxu1 %v1902_v10  ;;  %4261 = vmatpush3.bf16.msra.mxu1 %v4210_v9  ;;  %v2577_v10 = vsel %vm193_vm0, %v3536_v41, 0  ;;  %v5177_v60 = vsub.f32 %v2574_v25, %v5154_v62 }
  0x85   : > { %4213 = vmatpush3.bf16.msra.mxu0 %v4210_v9  ;;  %4263 = vmatprep.subr.msk.bf16.mxu1 %vm4827_vm4, %v4653_v31  ;;  %v5167_v54 = vsub.f32 %v979_v40, %v5151_v58  ;;  %v5169_v56 = vand.u32 4294901760, %v2577_v10  ;;  %v3541_v9 = vld [vmem:[%s4784_s4 + $0xb0] sm:$0xff] }
  0x86   : > { %3866 = vmatmul.mubr.f32.gmra.mrb[2].mxu0 %v317_v52  ;;  %4215 = vmatprep.subr.msk.bf16.mxu0 %vm4827_vm4, %v4653_v31  ;;  %v179_v52 = vld [vmem:[%s4784_s4 + $0x18] sm:$0xff]  ;;  %v2592_v37 = vsel %vm193_vm0, %v3541_v9, 0 }
  0x87   : > { %4058 = vmatmul.mubr.f32.gmra.mrb[2].mxu1 %v1912_v53  ;;  %3868 = vmatprep.mubr.f32.mxu0 %v5594_v26  ;;  %v3538_v53 = vld [vmem:[%s4784_s4 + $0x98] sm:$0xff]  ;;  %v988_v2 = vsel %vm193_vm0, %v179_v52, 0  ;;  %v1071_v61 = vand.u32 4294901760, %v5167_v54  ;;  %v5194_v1 = vsub.f32 %v2577_v10, %v5169_v56  ;;  %v1081_v26 = vand.u32 4294901760, %v5183_v50 }
  0x88   : > { %4060 = vmatprep.mubr.f32.mxu1 %v5595_v27  ;;  %v5204_v3 = vand.u32 4294901760, %v988_v2 }
  0x8a   : > { %3869 = vmatmul.mubr.f32.gmra.mrb[4].mxu0 %v5596_v29  ;;  %v994_v29 = vsel %vm193_vm0, %v181_v4, 0  ;;  %v5243_v25 = vsub.f32 %v988_v2, %v5204_v3 }
  0x8b   : > { %4061 = vmatmul.mubr.f32.gmra.mrb[4].mxu1 %v1932_v46  ;;  %3871 = vmatprep.mubr.f32.mxu0 %v5597_v32  ;;  %v180_v46 = vld [vmem:[%s4784_s4 + $0x20] sm:$0xff]  ;;  %v5222_v32 = vand.u32 4294901760, %v2586_v15  ;;  %v5248_v42 = vand.u32 4294901760, %v994_v29 }
  0x8c   : > { %4063 = vmatprep.mubr.f32.mxu1 %v5598_v33  ;;  %v991_v7 = vsel %vm193_vm0, %v180_v46, 0  ;;  %v183_v33 = vld [vmem:[%s4784_s4 + $0x38] sm:$0xff]  ;;  %v1101_v28 = vand.u32 4294901760, %v5243_v25 }
  0x8d   : > { %v5212_v27 = vand.u32 4294901760, %v991_v7  ;;  %v5264_v52 = vsub.f32 %v2586_v15, %v5222_v32 }
  0x8e   : > { %3872 = vmatmul.mubr.f32.gmra.mrb[6].mxu0 %v5599_v34  ;;  %v2676_v34 = vand.u32 4294901760, %v5194_v1 }
  0x8f   : > { %4064 = vmatmul.mubr.f32.gmra.mrb[6].mxu1 %v1952_v5  ;;  %3878 = vmatprep.mubr.f32.mxu0 %v4814_v17  ;;  %v2583_v5 = vsel %vm193_vm0, %v3538_v53, 0  ;;  %v5266_v53 = vand.u32 4294901760, %v2592_v37 }
  0x90   : > { %4070 = vmatprep.mubr.f32.mxu1 %v4816_v18  ;;  %v5206_v11 = vand.u32 4294901760, %v2583_v5  ;;  %v2677_v46 = vsub.f32 %v5194_v1, %v2676_v34 }
  0x92   : > { %3879 = vmatmul.mubr.f32.vlgmr.msra.gmra.mrb[0].mxu0 %v4822_v22  ;;  %v5246_v41 = vsub.f32 %v2583_v5, %v5206_v11  ;;  %v5282_v5 = vsub.f32 %v994_v29, %v5248_v42 }
  0x93   : > { %4071 = vmatmul.mubr.f32.vlgmr.msra.gmra.mrb[0].mxu1 %v4824_v23  ;;  %3881 = vmatprep.mubr.f32.mxu0 %v4865_v39 }
  0x94   : > { %4073 = vmatprep.mubr.f32.mxu1 %v4892_v51  ;;  %4265 = vmatpush3.bf16.msk.msra.mxu1 %vm4827_vm4, %v4653_v31  ;;  %v5580_v2 = vand.u32 4294901760, %v5246_v41 }
  0x95   : > { %4217 = vmatpush3.bf16.msk.msra.mxu0 %vm4827_vm4, %v4653_v31  ;;  %4267 = vmatprep.subr.msk.bf16.mxu1 %vm5014_vm6, %v4653_v31 }
  0x96   : > { %3882 = vmatmul.mubr.f32.gmra.mrb[2].mxu0 %v4910_v13  ;;  %4219 = vmatprep.subr.msk.bf16.mxu0 %vm5014_vm6, %v4653_v31 }
  0x97   : > { %4074 = vmatmul.mubr.f32.gmra.mrb[2].mxu1 %v4912_v14  ;;  %3884 = vmatprep.mubr.f32.mxu0 %v4916_v20 }
  0x98   : > { %4076 = vmatprep.mubr.f32.mxu1 %v4929_v43 }
  0x9a   : > { %3885 = vmatmul.mubr.f32.gmra.mrb[4].mxu0 %v4934_v45 }
  0x9b   : > { %4077 = vmatmul.mubr.f32.gmra.mrb[4].mxu1 %v4948_v57  ;;  %3887 = vmatprep.mubr.f32.mxu0 %v4950_v59 }
  0x9c   : > { %4079 = vmatprep.mubr.f32.mxu1 %v4975_v24 }
  0x9e   : > { %3888 = vmatmul.mubr.f32.gmra.mrb[6].mxu0 %v4993_v16 }
  0x9f   : > { %4080 = vmatmul.mubr.f32.gmra.mrb[6].mxu1 %v4996_v19  ;;  %3894 = vmatprep.mubr.f32.mxu0 %v4814_v17  ;;  %v5197_v17 = vsub.f32 %v985_v30, %v5171_v6  ;;  %v1000_v30 = vsel %vm193_vm0, %v183_v33, 0 }
  0xa0   : > { %4086 = vmatprep.mubr.f32.mxu1 %v4816_v18  ;;  %v2666_v18 = vand.u32 4294901760, %v5177_v60 }
  0xa1   : > { %v1091_v36 = vand.u32 4294901760, %v5197_v17 }
  0xa2   : > { %3895 = vmatmul.mubr.f32.vlgmr.msra.gmra.mrb[0].mxu0 %v4822_v22  ;;  %v5220_v22 = vsub.f32 %v2580_v8, %v5188_v63  ;;  %v2667_v40 = vsub.f32 %v5177_v60, %v2666_v18  ;;  %v1082_v8 = vsub.f32 %v5183_v50, %v1081_v26 }
  0xa3   : > { %4087 = vmatmul.mubr.f32.vlgmr.msra.gmra.mrb[0].mxu1 %v4824_v23  ;;  %3897 = vmatprep.mubr.f32.mxu0 %v4865_v39  ;;  %v2589_v23 = vsel %vm193_vm0, %v3540_v21, 0  ;;  %v997_v39 = vsel %vm193_vm0, %v182_v49, 0 }
  0xa4   : > { %4089 = vmatprep.mubr.f32.mxu1 %v4892_v51  ;;  %4269 = vmatpush3.bf16.msk.msra.mxu1 %vm5014_vm6, %v4653_v31  ;;  %v1072_v51 = vsub.f32 %v5167_v54, %v1071_v61  ;;  %v5256_v47 = vand.u32 4294901760, %v2589_v23  ;;  %v5258_v10 = vand.u32 4294901760, %v997_v39  ;;  %v2686_v35 = vand.u32 4294901760, %v5220_v22 }
  0xa5   : > { %4221 = vmatpush3.bf16.msk.msra.mxu0 %vm5014_vm6, %v4653_v31  ;;  %4271 = vmatprep.subr.bf16.mxu1 %v5038_v12  ;;  %v2668_v49 = vand.u32 4294901760, %v2667_v40  ;;  %v1083_v29 = vand.u32 4294901760, %v1082_v8 }
  0xa6   : > { %3898 = vmatmul.mubr.f32.gmra.mrb[2].mxu0 %v4910_v13  ;;  %4223 = vmatprep.subr.bf16.mxu0 %v5038_v12  ;;  %v5254_v13 = vsub.f32 %v991_v7, %v5212_v27  ;;  %v5284_v7 = vand.u32 4294901760, %v1000_v30  ;;  %v5290_v15 = vsub.f32 %v2589_v23, %v5256_v47  ;;  %v2687_v9 = vsub.f32 %v5220_v22, %v2686_v35 }
  0xa7   : > { %4090 = vmatmul.mubr.f32.gmra.mrb[2].mxu1 %v4912_v14  ;;  %3900 = vmatprep.mubr.f32.mxu0 %v4916_v20  ;;  %v2595_v14 = vsel %vm193_vm0, %v3542_v38, 0  ;;  %v1073_v20 = vand.u32 4294901760, %v1072_v51  ;;  %v2678_v23 = vand.u32 4294901760, %v2677_v46  ;;  %v1121_v51 = vand.u32 4294901760, %v5282_v5 }
  0xa8   : > { %4092 = vmatprep.mubr.f32.mxu1 %v4929_v43  ;;  %v1092_v43 = vsub.f32 %v5197_v17, %v1091_v36  ;;  %v5579_v4 = vand.u32 4294901760, %v5254_v13  ;;  %v5295_v21 = vand.u32 4294901760, %v2595_v14  ;;  %v5314_v38 = vsub.f32 %v1000_v30, %v5284_v7 }
  0xa9   : > { %v2688_v46 = vand.u32 4294901760, %v2687_v9 }
  0xaa   : > { %3901 = vmatmul.mubr.f32.gmra.mrb[4].mxu0 %v4934_v45  ;;  %v5293_v45 = vsub.f32 %v997_v39, %v5258_v10  ;;  %v1093_v33 = vand.u32 4294901760, %v1092_v43  ;;  %v1102_v39 = vsub.f32 %v5243_v25, %v1101_v28  ;;  %v5323_v8 = vsub.f32 %v2595_v14, %v5295_v21 }
  0xab   : > { %4093 = vmatmul.mubr.f32.gmra.mrb[4].mxu1 %v4948_v57  ;;  %3903 = vmatprep.mubr.f32.mxu0 %v4950_v59  ;;  %v2706_v57 = vand.u32 4294901760, %v5264_v52  ;;  %v5303_v59 = vsub.f32 %v2592_v37, %v5266_v53  ;;  %v2716_v37 = vand.u32 4294901760, %v5290_v15 }
  0xac   : > { %4095 = vmatprep.mubr.f32.mxu1 %v4975_v24  ;;  %v2697_v24 = vsub.f32 %v5246_v41, %v5580_v2  ;;  %v1131_v40 = vand.u32 4294901760, %v5293_v45  ;;  %v1141_v2 = vand.u32 4294901760, %v5314_v38 }
  0xad   : > { %v2707_v30 = vsub.f32 %v5264_v52, %v2706_v57 }
  0xae   : > { %3904 = vmatmul.mubr.f32.gmra.mrb[6].mxu0 %v4993_v16  ;;  %v1112_v16 = vsub.f32 %v5254_v13, %v5579_v4  ;;  %v2698_v43 = vand.u32 4294901760, %v2697_v24  ;;  %v1122_v4 = vsub.f32 %v5282_v5, %v1121_v51  ;;  %v1132_v9 = vsub.f32 %v5293_v45, %v1131_v40 }
  0xaf   : > { %4096 = vmatmul.mubr.f32.gmra.mrb[6].mxu1 %v4996_v19  ;;  %3910 = vmatprep.mubr.f32.mxu0 %v1073_v20  ;;  %v5581_v19 = vand.u32 4294901760, %v5303_v59  ;;  %v1103_v20 = vand.u32 4294901760, %v1102_v39  ;;  %v2708_v39 = vand.u32 4294901760, %v2707_v30  ;;  %v1142_v24 = vsub.f32 %v5314_v38, %v1141_v2 }
  0xb0   : > { %4102 = vmatprep.mubr.f32.mxu1 %v2668_v49  ;;  %v1113_v14 = vand.u32 4294901760, %v1112_v16  ;;  %v2717_v49 = vsub.f32 %v5290_v15, %v2716_v37 }
  0xb2   : > { %3911 = vmatmul.mubr.f32.vlgmr.msra.gmra.mrb[0].mxu0 %v1083_v29  ;;  %v2736_v29 = vand.u32 4294901760, %v5323_v8  ;;  %v2718_v16 = vand.u32 4294901760, %v2717_v49 }
  0xb3   : > { %4103 = vmatmul.mubr.f32.vlgmr.msra.gmra.mrb[0].mxu1 %v2678_v23  ;;  %3913 = vmatprep.mubr.f32.mxu0 %v1093_v33  ;;  %v2727_v23 = vsub.f32 %v5303_v59, %v5581_v19  ;;  %v1123_v33 = vand.u32 4294901760, %v1122_v4  ;;  %v1143_v19 = vand.u32 4294901760, %v1142_v24 }
  0xb4   : > { %4105 = vmatprep.mubr.f32.mxu1 %v2688_v46  ;;  %4273 = vmatpush3.bf16.msra.mxu1 %v5038_v12  ;;  %v1133_v46 = vand.u32 4294901760, %v1132_v9  ;;  %v2737_v30 = vsub.f32 %v5323_v8, %v2736_v29 }
  0xb5   : > { %4225 = vmatpush3.bf16.msra.mxu0 %v5038_v12  ;;  %4275 = vmatprep.subr.bf16.mxu1 %v5055_v48  ;;  %v2728_v12 = vand.u32 4294901760, %v2727_v23 }
  0xb6   : > { %3914 = vmatmul.mubr.f32.gmra.mrb[2].mxu0 %v1103_v20  ;;  %4227 = vmatprep.subr.bf16.mxu0 %v5055_v48  ;;  %v2738_v4 = vand.u32 4294901760, %v2737_v30 }
  0xb7   : > { %4106 = vmatmul.mubr.f32.gmra.mrb[2].mxu1 %v2698_v43  ;;  %3916 = vmatprep.mubr.f32.mxu0 %v1113_v14 }
  0xb8   : > { %4108 = vmatprep.mubr.f32.mxu1 %v2708_v39 }
  0xba   : > { %3917 = vmatmul.mubr.f32.gmra.mrb[4].mxu0 %v1123_v33 }
  0xbb   : > { %4109 = vmatmul.mubr.f32.gmra.mrb[4].mxu1 %v2718_v16  ;;  %3919 = vmatprep.mubr.f32.mxu0 %v1133_v46 }
  0xbc   : > { %4111 = vmatprep.mubr.f32.mxu1 %v2728_v12 }
  0xbe   : > { %3920 = vmatmul.mubr.f32.gmra.mrb[6].mxu0 %v1143_v19 }
  0xbf   : > { %4112 = vmatmul.mubr.f32.gmra.mrb[6].mxu1 %v2738_v4  ;;  %3926 = vmatprep.mubr.f32.mxu0 %v5151_v58 }
  0xc0   : > { %4118 = vmatprep.mubr.f32.mxu1 %v5154_v62 }
  0xc2   : > { %3927 = vmatmul.mubr.f32.vlgmr.msra.gmra.mrb[0].mxu0 %v5161_v44 }
  0xc3   : > { %4119 = vmatmul.mubr.f32.vlgmr.msra.gmra.mrb[0].mxu1 %v5169_v56  ;;  %3929 = vmatprep.mubr.f32.mxu0 %v5171_v6 }
  0xc4   : > { %4121 = vmatprep.mubr.f32.mxu1 %v5188_v63  ;;  %4277 = vmatpush3.bf16.msra.mxu1 %v5055_v48 }
  0xc5   : > { %4229 = vmatpush3.bf16.msra.mxu0 %v5055_v48  ;;  %4279 = vmatprep.subr.msk.bf16.mxu1 %vm5014_vm6, %v4653_v31  ;;  %v5600_v48 = vand.u32 4294901760, %v5246_v41 }
  0xc6   : > { %3930 = vmatmul.mubr.f32.gmra.mrb[2].mxu0 %v5204_v3  ;;  %4231 = vmatprep.subr.msk.bf16.mxu0 %vm5014_vm6, %v4653_v31 }
  0xc7   : > { %4122 = vmatmul.mubr.f32.gmra.mrb[2].mxu1 %v5206_v11  ;;  %3932 = vmatprep.mubr.f32.mxu0 %v5212_v27 }
  0xc8   : > { %4124 = vmatprep.mubr.f32.mxu1 %v5222_v32 }
  0xca   : > { %3933 = vmatmul.mubr.f32.gmra.mrb[4].mxu0 %v5248_v42 }
  0xcb   : > { %4125 = vmatmul.mubr.f32.gmra.mrb[4].mxu1 %v5256_v47  ;;  %3935 = vmatprep.mubr.f32.mxu0 %v5258_v10 }
  0xcc   : > { %4127 = vmatprep.mubr.f32.mxu1 %v5266_v53 }
  0xce   : > { %3936 = vmatmul.mubr.f32.gmra.mrb[6].mxu0 %v5284_v7 }
  0xcf   : > { %4128 = vmatmul.mubr.f32.gmra.mrb[6].mxu1 %v5295_v21  ;;  %3942 = vmatprep.mubr.f32.mxu0 %v5167_v54  ;;  %v5601_v54 = vand.u32 4294901760, %v5254_v13 }
  0xd0   : > { %4134 = vmatprep.mubr.f32.mxu1 %v5177_v60 }
  0xd2   : > { %3943 = vmatmul.mubr.f32.vlgmr.msra.gmra.mrb[0].mxu0 %v5183_v50 }
  0xd3   : > { %4135 = vmatmul.mubr.f32.vlgmr.msra.gmra.mrb[0].mxu1 %v5194_v1  ;;  %3945 = vmatprep.mubr.f32.mxu0 %v5197_v17 }
  0xd4   : > { %4137 = vmatprep.mubr.f32.mxu1 %v5220_v22  ;;  %4281 = vmatpush3.bf16.msk.msra.mxu1 %vm5014_vm6, %v4653_v31 }
  0xd5   : > { %4233 = vmatpush3.bf16.msk.msra.mxu0 %vm5014_vm6, %v4653_v31  ;;  %4283 = vmatprep.subr.bf16.mxu1 %v5057_v0 }
  0xd6   : > { %3946 = vmatmul.mubr.f32.gmra.mrb[2].mxu0 %v5243_v25  ;;  %4235 = vmatprep.subr.bf16.mxu0 %v5057_v0 }
  0xd7   : > { %4138 = vmatmul.mubr.f32.gmra.mrb[2].mxu1 %v5246_v41  ;;  %3948 = vmatprep.mubr.f32.mxu0 %v5254_v13 }
  0xd8   : > { %4140 = vmatprep.mubr.f32.mxu1 %v5264_v52 }
  0xda   : > { %3949 = vmatmul.mubr.f32.gmra.mrb[4].mxu0 %v5282_v5 }
  0xdb   : > { %4141 = vmatmul.mubr.f32.gmra.mrb[4].mxu1 %v5290_v15  ;;  %3951 = vmatprep.mubr.f32.mxu0 %v5293_v45 }
  0xdc   : > { %4143 = vmatprep.mubr.f32.mxu1 %v5303_v59 }
  0xde   : > { %3952 = vmatmul.mubr.f32.gmra.mrb[6].mxu0 %v5314_v38 }
  0xdf   : > { %4144 = vmatmul.mubr.f32.gmra.mrb[6].mxu1 %v5323_v8  ;;  %3958 = vmatprep.mubr.f32.mxu0 %v1071_v61 }
  0xe0   : > { %4150 = vmatprep.mubr.f32.mxu1 %v2666_v18 }
  0xe2   : > { %3959 = vmatmul.mubr.f32.vlgmr.msra.gmra.mrb[0].mxu0 %v1081_v26 }
  0xe3   : > { %4151 = vmatmul.mubr.f32.vlgmr.msra.gmra.mrb[0].mxu1 %v2676_v34  ;;  %3961 = vmatprep.mubr.f32.mxu0 %v1091_v36 }
  0xe4   : > { %4153 = vmatprep.mubr.f32.mxu1 %v2686_v35  ;;  %4285 = vmatpush3.bf16.msra.mxu1 %v5057_v0 }
  0xe5   : > { %4237 = vmatpush3.bf16.msra.mxu0 %v5057_v0  ;;  %4287 = vmatprep.subr.msk.bf16.mxu1 %vm5014_vm6, %v4653_v31  ;;  %v5602_v0 = vand.u32 4294901760, %v5303_v59 }
  0xe6   : > { %3962 = vmatmul.mubr.f32.gmra.mrb[2].mxu0 %v1101_v28  ;;  %4239 = vmatprep.subr.msk.bf16.mxu0 %vm5014_vm6, %v4653_v31 }
  0xe7   : > { %4154 = vmatmul.mubr.f32.gmra.mrb[2].mxu1 %v5600_v48  ;;  %3964 = vmatprep.mubr.f32.mxu0 %v5601_v54 }
  0xe8   : > { %4156 = vmatprep.mubr.f32.mxu1 %v2706_v57 }
  0xea   : > { %3965 = vmatmul.mubr.f32.gmra.mrb[4].mxu0 %v1121_v51 }
  0xeb   : > { %4157 = vmatmul.mubr.f32.gmra.mrb[4].mxu1 %v2716_v37  ;;  %3967 = vmatprep.mubr.f32.mxu0 %v1131_v40 }
  0xec   : > { %4159 = vmatprep.mubr.f32.mxu1 %v5602_v0 }
  0xee   : > { %3968 = vmatmul.mubr.f32.gmra.mrb[6].mxu0 %v1141_v2 }
  0xef   : > { %4160 = vmatmul.mubr.f32.gmra.mrb[6].mxu1 %v2736_v29  ;;  %3974 = vmatprep.mubr.f32.mxu0 %v5151_v58 }
  0xf0   : > { %4166 = vmatprep.mubr.f32.mxu1 %v5154_v62 }
  0xf2   : > { %3975 = vmatmul.mubr.f32.vlgmr.msra.gmra.mrb[0].mxu0 %v5161_v44 }
  0xf3   : > { %4167 = vmatmul.mubr.f32.vlgmr.msra.gmra.mrb[0].mxu1 %v5169_v56  ;;  %3977 = vmatprep.mubr.f32.mxu0 %v5171_v6 }
  0xf4   : > { %4169 = vmatprep.mubr.f32.mxu1 %v5188_v63  ;;  %4289 = vmatpush3.bf16.msk.msra.mxu1 %vm5014_vm6, %v4653_v31 }
  0xf5   : > { %4241 = vmatpush3.bf16.msk.msra.mxu0 %vm5014_vm6, %v4653_v31 }
  0xf6   : > { %3978 = vmatmul.mubr.f32.gmra.mrb[2].mxu0 %v5204_v3 }
  0xf7   : > { %4170 = vmatmul.mubr.f32.gmra.mrb[2].mxu1 %v5206_v11  ;;  %3980 = vmatprep.mubr.f32.mxu0 %v5212_v27 }
  0xf8   : > { %4172 = vmatprep.mubr.f32.mxu1 %v5222_v32 }
  0xfa   : > { %3981 = vmatmul.mubr.f32.gmra.mrb[4].mxu0 %v5248_v42 }
  0xfb   : > { %4173 = vmatmul.mubr.f32.gmra.mrb[4].mxu1 %v5256_v47  ;;  %3983 = vmatprep.mubr.f32.mxu0 %v5258_v10 }
  0xfc   : > { %4175 = vmatprep.mubr.f32.mxu1 %v5266_v53 }
  0xfe   : > { %3984 = vmatmul.mubr.f32.gmra.mrb[6].mxu0 %v5284_v7 }
  0xff   : > { %4176 = vmatmul.mubr.f32.gmra.mrb[6].mxu1 %v5295_v21  ;;  %3990 = vmatprep.mubr.f32.mxu0 %v5151_v58 }
 0x100   : > { %4182 = vmatprep.mubr.f32.mxu1 %v5154_v62 }
 0x102   : > { %3991 = vmatmul.mubr.f32.vlgmr.msra.gmra.mrb[0].mxu0 %v5161_v44 }
 0x103   : > { %4183 = vmatmul.mubr.f32.vlgmr.msra.gmra.mrb[0].mxu1 %v5169_v56  ;;  %3993 = vmatprep.mubr.f32.mxu0 %v5171_v6 }
 0x104   : > { %4185 = vmatprep.mubr.f32.mxu1 %v5188_v63 }
 0x106   : > { %3994 = vmatmul.mubr.f32.gmra.mrb[2].mxu0 %v5204_v3 }
 0x107   : > { %4186 = vmatmul.mubr.f32.gmra.mrb[2].mxu1 %v5206_v11  ;;  %3996 = vmatprep.mubr.f32.mxu0 %v5212_v27 }
 0x108   : > { %4188 = vmatprep.mubr.f32.mxu1 %v5222_v32 }
 0x10a   : > { %3997 = vmatmul.mubr.f32.gmra.mrb[4].mxu0 %v5248_v42 }
 0x10b   : > { %4189 = vmatmul.mubr.f32.gmra.mrb[4].mxu1 %v5256_v47  ;;  %3999 = vmatprep.mubr.f32.mxu0 %v5258_v10 }
 0x10c   : > { %4191 = vmatprep.mubr.f32.mxu1 %v5266_v53 }
 0x10e   : > { %4000 = vmatmul.mubr.f32.gmra.mrb[6].mxu0 %v5284_v7 }
 0x10f   : > { %4192 = vmatmul.mubr.f32.gmra.mrb[6].mxu1 %v5295_v21 }
 0x1d5   : > { %v3992_v31 = vpop.f32.mrb[0].mxu0 }
 0x1d6   : > { %1764 = vst.msk [vmem:[%s5480_s27 + $0x8] sm:$0xff] %vm1762_vm7, %v3992_v31  ;;  %v4184_v55 = vpop.f32.mrb[0].mxu1  ;;  %v1716_v58 = vpop.f32.mrb[1].mxu0 }
 0x1d7   : > { %3367 = vrot.lane.b32.xlu0 %v4184_v55, %s4654_s29  ;;  %1763 = vst.msk [vmem:[%s5480_s27] sm:$0xff] %vm1762_vm7, %v1716_v58  ;;  %v3311_v62 = vpop.f32.mrb[1].mxu1 }
 0x1d9   : > { %v3995_v44 = vpop.f32.mrb[2].mxu0 }
 0x1da   : > { %1766 = vst.msk [vmem:[%s5480_s27 + $0x18] sm:$0xff] %vm1762_vm7, %v3995_v44  ;;  %v4187_v56 = vpop.f32.mrb[2].mxu1  ;;  %v1728_v6 = vpop.f32.mrb[3].mxu0 }
 0x1db   : > { %3365 = vrot.lane.b32.xlu0 %v3311_v62, %s4654_s29  ;;  %3371 = vrot.lane.b32.xlu1 %v4187_v56, %s4654_s29  ;;  %1765 = vst.msk [vmem:[%s5480_s27 + $0x10] sm:$0xff] %vm1762_vm7, %v1728_v6  ;;  %v3323_v60 = vpop.f32.mrb[3].mxu1 }
 0x1dd   : > { %v3998_v50 = vpop.f32.mrb[4].mxu0 }
 0x1de   : > { %1768 = vst.msk [vmem:[%s5480_s27 + $0x28] sm:$0xff] %vm1762_vm7, %v3998_v50  ;;  %v4190_v63 = vpop.f32.mrb[4].mxu1  ;;  %v1740_v61 = vpop.f32.mrb[5].mxu0 }
 0x1df   : > { %3369 = vrot.lane.b32.xlu1 %v3323_v60, %s4654_s29  ;;  %1767 = vst.msk [vmem:[%s5480_s27 + $0x20] sm:$0xff] %vm1762_vm7, %v1740_v61  ;;  %v3335_v1 = vpop.f32.mrb[5].mxu1 }
 0x1e0   : > { %3373 = vrot.lane.b32.xlu0 %v3335_v1, %s4654_s29 }
 0x1e1   : > { %v4001_v17 = vpop.f32.mrb[6].mxu0 }
 0x1e2   : > { %1770 = vst.msk [vmem:[%s5480_s27 + $0x38] sm:$0xff] %vm1762_vm7, %v4001_v17  ;;  %v4193_v18 = vpop.f32.mrb[6].mxu1  ;;  %v1752_v3 = vpop.f32.mrb[7].mxu0 }
 0x1e3   : > { %3375 = vrot.lane.b32.xlu1 %v4190_v63, %s4654_s29  ;;  %1769 = vst.msk [vmem:[%s5480_s27 + $0x30] sm:$0xff] %vm1762_vm7, %v1752_v3  ;;  %v3347_v11 = vpop.f32.mrb[7].mxu1 }
 0x1e4   : > { %3377 = vrot.lane.b32.xlu0 %v3347_v11, %s4654_s29 }
 0x1e7   : > { %3379 = vrot.lane.b32.xlu1 %v4193_v18, %s4654_s29 }
 0x249   : > { %v3368_v26 = vpop.permute.xlu0 %3367 }
 0x24a   : > { %3391 = vst.msk [vmem:[%s5480_s27 + $0x8] sm:$0xff] %vm3389_vm8, %v3368_v26 }
 0x24d   : > { %v3366_v27 = vpop.permute.xlu0 %3365  ;;  %v3372_v22 = vpop.permute.xlu1 %3371 }
 0x24e   : > { %3390 = vst.msk [vmem:[%s5480_s27] sm:$0xff] %vm3389_vm8, %v3366_v27  ;;  %3393 = vst.msk [vmem:[%s5480_s27 + $0x18] sm:$0xff] %vm3389_vm8, %v3372_v22 }
 0x251   : > { %v3370_v32 = vpop.permute.xlu1 %3369 }
 0x252   : > { %3392 = vst.msk [vmem:[%s5480_s27 + $0x10] sm:$0xff] %vm3389_vm8, %v3370_v32  ;;  %v3374_v34 = vpop.permute.xlu0 %3373 }
 0x253   : > { %3394 = vst.msk [vmem:[%s5480_s27 + $0x20] sm:$0xff] %vm3389_vm8, %v3374_v34 }
 0x255   : > { %v3376_v36 = vpop.permute.xlu1 %3375 }
 0x256   : > { %3395 = vst.msk [vmem:[%s5480_s27 + $0x28] sm:$0xff] %vm3389_vm8, %v3376_v36  ;;  %v3378_v25 = vpop.permute.xlu0 %3377 }
 0x257   : > { %3396 = vst.msk [vmem:[%s5480_s27 + $0x30] sm:$0xff] %vm3389_vm8, %v3378_v25 }
 0x259   : > { %v3380_v41 = vpop.permute.xlu1 %3379 }
 0x25a   : > { %3397 = vst.msk [vmem:[%s5480_s27 + $0x38] sm:$0xff] %vm3389_vm8, %v3380_v41 }
 0x25b   : > { %4578 = shalt.err (!%p4575_p5)
}
 0x25c   : > { %s4579_s23 = scalar_lea.hbm %s5517_s13, 1024  ;;  %s4583_s28 = scalar_lea.hbm %s5571_s1, 2048 }
 0x25d   : > { %p4580_p4 = scmp.ne.s32.totalorder %s5517_s13, %s4579_s23  ;;  %p4584_p12 = scmp.lt.u32.totalorder %s5517_s13, %s5571_s1 }
 0x25e   : > { %p4585_p1 = scmp.lt.u32.totalorder %s4583_s28, %s4579_s23  ;;  %p4587_p8 = scmp.lt.u32.totalorder %s4579_s23, %s5517_s13 }
 0x25f   : > { %p4581_p7 = pnand %p4580_p4, %p5603_p9 }
 0x260   : > { %p4586_p3 = por %p4585_p1, %p4584_p12 }
 0x261   : > { %p4582_p10 = pneg %p4581_p7 }
 0x262   : > { %p4588_p11 = por %p4587_p8, %p4586_p3 }
 0x264   : > { %p4589_p0 = pnand %p4588_p11, %p4582_p10 }
 0x266   : > { %4592 = shalt.err (!%p4589_p0)
}
 0x267   : > { %s4656_s18 = smov 128   ;;  %s4657_s27 = smov 8  }
 0x268   : > { %4468 = dma.vmem_to_hbm [thread:$0]  (%p5603_p9), %s5519_s2, 1024, %s5517_s13, %s3399_s9, %s4656_s18, %s4656_s18, %s4657_s27  }
 0x269 PF: > { %s3429_s29 = sand.u32 1, %s4627_s6   ;;  %p5604_p6 = scmp.ne.s32.totalorder %s5585_s21, 0 }
 0x26a   : > { %p5605_p13 = scmp.ge.s32.totalorder %s4647_s11, 2  ;;  %s3430_s30 = scalar_lea.sflag [#allocation4], %s3429_s29 }
 0x26c   : > { %p4475_p2 = pnand %p5605_p13, %p5604_p6 }
 0x26e   : > { %4622 = dma.done.wait (!%p4475_p2), %s3430_s30, 1024  }
 0x26f   : > { %4624 = vsyncadd (!%p4475_p2), %s3430_s30, 4294966272  ;;  %s17_s11 = sadd.s32 1, %s4647_s11   ;;  %s5606_s6 = smov %s4631_s7 }
 0x270   : > { %p14_p5 = scmp.ge.s32.totalorder %s17_s11, 4   ;;  %s5607_s7 = smov %s4635_s8 }
 0x271   : > { %s5608_s8 = smov %s4724_s20  ;;  %s5609_s9 = smov %s4643_s10 }
 0x272   : > { %s5610_s10 = smov %s5612_s14  ;;  %16 = sbr.rel (!%p14_p5) target bundleno = 6 (0x6), region = 72 }
 0x279   :  { %3435 = vsyncpa [#allocation3], 1 }
 0x27a   :  { %3437 = vsyncpa [#allocation3 + $0x1], 1 }
 0x27b   :  { %3438 = vsyncpa [#allocation4], 1 }
 0x27c   :  { %3440 = vsyncpa [#allocation4 + $0x1], 1 }

</bundles_post_ra>
